<compile_context>
chip_gen: v6e
topology: v6e:2x2x1
jax: 0.10.0
libtpu: 0.0.40
codegen_flags: <defaults>
</compile_context>

<pallas_src>
from functools import partial

import jax
import jax.numpy as jnp
import numpy as np
from jax.experimental import pallas as pl
from jax.experimental.pallas import tpu as pltpu


def _embed_transpose_kernel(idx_ref, planes_ref, o_ref, acc_ref=None, *,
                            num_chunks):
    """One (token-tile, vocab-chunk) grid step of the fused gather+transpose.

    idx_ref    : VMEM (1, T)   int32   token ids of this tile
    planes_ref : VMEM (P, Vc, E)       table chunk (P=3 bf16 planes for f32)
    o_ref      : VMEM (E, T)           gathered rows, already transposed
    acc_ref    : VMEM (E, T)   f32     accumulator (only when num_chunks > 1)
    """
    k = pl.program_id(1)
    chunk_v = planes_ref.shape[1]

    # One-hot for this vocab chunk: (Vc, 1) iota broadcast against (1, T) ids.
    local = idx_ref[...] - k * chunk_v                           # (1, T)
    row_iota = jax.lax.broadcasted_iota(jnp.int32, (chunk_v, 1), 0)
    onehot = (row_iota == local).astype(planes_ref.dtype)        # (Vc, T)

    # (Vc, E) . (Vc, T) over the vocab axis -> (E, T): gather and
    # permute(0, 2, 1) collapse into a single MXU contraction.  DEFAULT
    # precision is exact because the one-hot is 0/1 and f32 tables arrive as
    # exact bf16 planes summed in the f32 accumulator.
    part = jax.lax.dot_general(
        planes_ref[0], onehot,
        dimension_numbers=(((0,), (0,)), ((), ())),
        preferred_element_type=jnp.float32)
    for p in range(1, planes_ref.shape[0]):                      # static unroll
        part += jax.lax.dot_general(
            planes_ref[p], onehot,
            dimension_numbers=(((0,), (0,)), ((), ())),
            preferred_element_type=jnp.float32)

    if num_chunks == 1:                                          # static branch
        o_ref[...] = part.astype(o_ref.dtype)
        return

    @pl.when(k == 0)
    def _():
        acc_ref[...] = part

    @pl.when(k > 0)
    def _():
        acc_ref[...] += part

    @pl.when(k == num_chunks - 1)
    def _():
        o_ref[...] = acc_ref[...].astype(o_ref.dtype)


def transpose_embed(indices, table, *, _vocab_chunk=None):
    """indices: (B, S) int, table: (V, E) float  ->  (B, E, S) float."""
    batch, seq_len = indices.shape
    vocab, embed = table.shape
    out_dtype = table.dtype
    out_itemsize = jnp.dtype(out_dtype).itemsize
    total = batch * seq_len

    # ---- Per-generation VMEM budget (v7x: 64 MiB/TC, v5e/v6e: 128 MiB). ----
    try:
        phys_vmem = int(pltpu.get_tpu_info().vmem_capacity_bytes)
    except Exception:
        phys_vmem = 64 << 20                 # conservative floor (v7x per-TC)
    budget = (phys_vmem * 3) // 4            # ~48 MiB v7x / ~96 MiB v5e,v6e

    # ---- Table planes: f32 -> 3 exact bf16 planes (3 MXU passes, not ~6). ----
    if table.dtype == jnp.float32:
        hi = table.astype(jnp.bfloat16)
        r1 = table - hi.astype(jnp.float32)
        mid = r1.astype(jnp.bfloat16)
        lo = (r1 - mid.astype(jnp.float32)).astype(jnp.bfloat16)
        planes = jnp.stack([hi, mid, lo])                  # (3, V, E) bf16
    else:
        planes = table[None]                               # (1, V, E)
    n_planes = planes.shape[0]
    plane_itemsize = jnp.dtype(planes.dtype).itemsize

    # ---- Vocab (contraction) chunking. ----
    table_bytes = n_planes * vocab * embed * plane_itemsize
    chunk_v = vocab
    if _vocab_chunk is not None and vocab % _vocab_chunk == 0:
        chunk_v = int(_vocab_chunk)
    elif table_bytes > budget // 2:
        for c in (1024, 512, 256, 128):
            if vocab % c == 0:
                chunk_v = c
                break
        # TODO(synk): vocabularies with no multiple-of-128 divisor still load
        # the whole table in one chunk; pad the table rows to a multiple of
        # 128 if such shapes must scale past the VMEM budget.
    num_chunks = vocab // chunk_v
    chunk_bytes = n_planes * chunk_v * embed * plane_itemsize
    table_bufs = 1 if num_chunks == 1 else 2   # constant index map -> 1 buffer

    # ---- VMEM-aware cap on tokens per tile. ----
    per_token = (chunk_v * plane_itemsize                  # one-hot intermediate
                 + 2 * embed * out_itemsize                # double-buffered out
                 + (embed * 4 if num_chunks > 1 else 0)    # f32 accumulator
                 + 2 * 4)                                  # ids block
    avail = budget - table_bufs * chunk_bytes - (4 << 20)
    max_tokens = int(min(4096, max(128, avail // per_token)))

    def vmem_limit_for(t):
        est = (table_bufs * chunk_bytes
               + 2 * embed * t * out_itemsize
               + (embed * t * 4 if num_chunks > 1 else 0)
               + chunk_v * t * plane_itemsize
               + 2 * t * 4
               + (4 << 20))
        return int(min(budget, max(32 << 20, est)))

    def scratch_for(t):
        if num_chunks == 1:
            return []
        return [pltpu.VMEM((embed, t), jnp.float32)]

    kernel = partial(_embed_transpose_kernel, num_chunks=num_chunks)
    try:
        table_spec = pl.BlockSpec((n_planes, chunk_v, embed),
                                  lambda i, k: (0, k, 0),
                                  pipeline_mode=pl.Buffered(table_bufs))
    except (TypeError, AttributeError):
        table_spec = pl.BlockSpec((n_planes, chunk_v, embed),
                                  lambda i, k: (0, k, 0))

    idx_flat = indices.reshape(1, total).astype(jnp.int32)

    # ---- Path A: lane-dense seq_len -> emit (B, E, S) directly. ----
    if seq_len % 128 == 0 and seq_len <= max_tokens and batch >= 2:
        return pl.pallas_call(
            kernel,
            grid=(batch, num_chunks),
            in_specs=[
                pl.BlockSpec((1, seq_len), lambda i, k: (0, i)),
                table_spec,
            ],
            out_specs=pl.BlockSpec((None, embed, seq_len),
                                   lambda i, k: (i, 0, 0)),
            out_shape=jax.ShapeDtypeStruct((batch, embed, seq_len), out_dtype),
            scratch_shapes=scratch_for(seq_len),
            compiler_params=pltpu.CompilerParams(
                dimension_semantics=("parallel", "arbitrary"),
                vmem_limit_bytes=vmem_limit_for(seq_len)),
        )(idx_flat, planes)

    # ---- Path B: lane-dense (E, tokens) slab over the 128-padded flattened
    #      token axis; wrapper does only the cheap batch-axis move. ----
    padded128 = -(-total // 128) * 128
    cap = max(128, (max_tokens // 128) * 128)
    min_tiles = 2 if total >= 256 else 1          # keep both v7x TCs busy
    num_tiles = max(min_tiles, -(-padded128 // cap))
    tile = -(-padded128 // (num_tiles * 128)) * 128
    padded_total = num_tiles * tile

    if padded_total > total:
        # Out-of-range id -> all-zero columns, sliced off below.
        pad_ids = jnp.full((1, padded_total - total), vocab, jnp.int32)
        idx_in = jnp.concatenate([idx_flat, pad_ids], axis=1)
    else:
        idx_in = idx_flat

    out_flat = pl.pallas_call(
        kernel,
        grid=(num_tiles, num_chunks),
        in_specs=[
            pl.BlockSpec((1, tile), lambda i, k: (0, i)),
            table_spec,
        ],
        out_specs=pl.BlockSpec((embed, tile), lambda i, k: (0, i)),
        out_shape=jax.ShapeDtypeStruct((embed, padded_total), out_dtype),
        scratch_shapes=scratch_for(tile),
        compiler_params=pltpu.CompilerParams(
            dimension_semantics=("parallel", "arbitrary"),
            vmem_limit_bytes=vmem_limit_for(tile)),
    )(idx_in, planes)

    # (E, B*S) -> (B, E, S): batch-axis move only; the per-token E<->S
    # transpose already happened inside the kernel.
    return (out_flat[:, :total]
            .reshape(embed, batch, seq_len)
            .transpose(1, 0, 2))


if __name__ == "__main__":
    key = jax.random.PRNGKey(0)

    def reference(idx, tab):
        # nn.Embedding lookup followed by permute(0, 2, 1).
        return jnp.transpose(jnp.take(tab, idx, axis=0), (0, 2, 1))

    cases = [
        # (batch, seq_len, vocab, embed, dtype, forced vocab chunk)
        (2, 8, 16, 128, jnp.float32, None),    # tiny/odd S -> flat-slab path
        (2, 128, 16, 128, jnp.float32, None),  # lane-dense S -> direct (B,E,S)
        (2, 8, 16, 128, jnp.bfloat16, None),   # single-plane bf16 table
        (2, 8, 256, 128, jnp.float32, 128),    # chunked-vocab accumulator path
    ]
    for batch, seq_len, vocab, embed, dtype, chunk in cases:
        key, k_tab, k_idx = jax.random.split(key, 3)
        table = jax.random.normal(k_tab, (vocab, embed),
                                  dtype=jnp.float32).astype(dtype)
        idx = jax.random.randint(k_idx, (batch, seq_len), 0, vocab,
                                 dtype=jnp.int32)
        out = jax.block_until_ready(
            transpose_embed(idx, table, _vocab_chunk=chunk))
        ref = reference(idx, table)
        assert out.shape == (batch, embed, seq_len), out.shape
        np.testing.assert_allclose(np.asarray(out, dtype=np.float32),
                                   np.asarray(ref, dtype=np.float32),
                                   rtol=2e-6, atol=2e-6)

    print("KERNEL_OK")
</pallas_src>

<mosaic_0001>
module attributes {stable_mosaic.version = 11 : i64} {
  func.func @_embed_transpose_kernel(%arg0: i32, %arg1: i32, %arg2: memref<1x128xi32, #tpu.memory_space<vmem>>, %arg3: memref<3x16x128xbf16, #tpu.memory_space<vmem>>, %arg4: memref<128x128xf32, #tpu.memory_space<vmem>>) attributes {dimension_semantics = [#tpu.dimension_semantics<parallel>, #tpu.dimension_semantics<arbitrary>], iteration_bounds = array<i64: 1, 1>, scalar_prefetch = 0 : i64, scratch_operands = 0 : i64, tpu.core_type = #tpu.core_type<tc>, window_params = [{transform_indices = @transform_0, window_bounds = array<i64: 1, 128>}, {pipeline_mode = #tpu.pipeline_mode<synchronous>, transform_indices = @transform_1, window_bounds = array<i64: 3, 16, 128>}, {transform_indices = @transform_2, window_bounds = array<i64: 128, 128>}]} {
    %c0 = arith.constant 0 : index
    %c0_0 = arith.constant 0 : index
    %0 = vector.load %arg2[%c0, %c0_0] : memref<1x128xi32, #tpu.memory_space<vmem>>, vector<1x128xi32>
    %c16_i32 = arith.constant 16 : i32
    %1 = arith.muli %arg1, %c16_i32 : i32
    %2 = vector.broadcast %1 : i32 to vector<1x128xi32>
    %3 = arith.subi %0, %2 : vector<1x128xi32>
    %4 = tpu.iota {dimensions = array<i32: 0>} : vector<16x1xi32>
    %5 = vector.broadcast %4 : vector<16x1xi32> to vector<16x128xi32>
    %6 = vector.broadcast %3 : vector<1x128xi32> to vector<16x128xi32>
    %7 = arith.cmpi eq, %5, %6 : vector<16x128xi32>
    %8 = arith.extui %7 : vector<16x128xi1> to vector<16x128xi32>
    %9 = arith.sitofp %8 : vector<16x128xi32> to vector<16x128xf32>
    %10 = arith.truncf %9 : vector<16x128xf32> to vector<16x128xbf16>
    %c0_1 = arith.constant 0 : index
    %c0_2 = arith.constant 0 : index
    %c0_3 = arith.constant 0 : index
    %11 = vector.load %arg3[%c0_1, %c0_2, %c0_3] : memref<3x16x128xbf16, #tpu.memory_space<vmem>>, vector<1x16x128xbf16>
    %12 = vector.shape_cast %11 : vector<1x16x128xbf16> to vector<16x128xbf16>
    %cst = arith.constant dense<0.000000e+00> : vector<128x128xf32>
    %13 = tpu.matmul %12, %10, %cst {dimension_numbers = #tpu.dot_dimension_numbers<[0], [0], [1], [1], [0, 1, 1, 1], [], []>} : vector<16x128xbf16>, vector<16x128xbf16>, vector<128x128xf32> -> vector<128x128xf32>
    %c1 = arith.constant 1 : index
    %c0_4 = arith.constant 0 : index
    %c0_5 = arith.constant 0 : index
    %14 = vector.load %arg3[%c1, %c0_4, %c0_5] : memref<3x16x128xbf16, #tpu.memory_space<vmem>>, vector<1x16x128xbf16>
    %15 = vector.shape_cast %14 : vector<1x16x128xbf16> to vector<16x128xbf16>
    %cst_6 = arith.constant dense<0.000000e+00> : vector<128x128xf32>
    %16 = tpu.matmul %15, %10, %cst_6 {dimension_numbers = #tpu.dot_dimension_numbers<[0], [0], [1], [1], [0, 1, 1, 1], [], []>} : vector<16x128xbf16>, vector<16x128xbf16>, vector<128x128xf32> -> vector<128x128xf32>
    %17 = arith.addf %13, %16 : vector<128x128xf32>
    %c2 = arith.constant 2 : index
    %c0_7 = arith.constant 0 : index
    %c0_8 = arith.constant 0 : index
    %18 = vector.load %arg3[%c2, %c0_7, %c0_8] : memref<3x16x128xbf16, #tpu.memory_space<vmem>>, vector<1x16x128xbf16>
    %19 = vector.shape_cast %18 : vector<1x16x128xbf16> to vector<16x128xbf16>
    %cst_9 = arith.constant dense<0.000000e+00> : vector<128x128xf32>
    %20 = tpu.matmul %19, %10, %cst_9 {dimension_numbers = #tpu.dot_dimension_numbers<[0], [0], [1], [1], [0, 1, 1, 1], [], []>} : vector<16x128xbf16>, vector<16x128xbf16>, vector<128x128xf32> -> vector<128x128xf32>
    %21 = arith.addf %17, %20 : vector<128x128xf32>
    %c0_10 = arith.constant 0 : index
    %c0_11 = arith.constant 0 : index
    %22 = vector.load %arg4[%c0_10, %c0_11] : memref<128x128xf32, #tpu.memory_space<vmem>>, vector<128x128xf32>
    tpu.vector_store %arg4[%c0_10, %c0_11], %21 {strides = array<i32>} : memref<128x128xf32, #tpu.memory_space<vmem>>, vector<128x128xf32>,
    return
  }
  func.func @transform_0(%arg0: i32, %arg1: i32) -> (i32, i32) {
    %c0_i32 = arith.constant 0 : i32
    %c0_i32_0 = arith.constant 0 : i32
    return %c0_i32, %arg0 : i32, i32
  }
  func.func @transform_1(%arg0: i32, %arg1: i32) -> (i32, i32, i32) {
    %c0_i32 = arith.constant 0 : i32
    %c0_i32_0 = arith.constant 0 : i32
    %c0_i32_1 = arith.constant 0 : i32
    return %c0_i32, %arg1, %c0_i32_0 : i32, i32, i32
  }
  func.func @transform_2(%arg0: i32, %arg1: i32) -> (i32, i32) {
    %c0_i32 = arith.constant 0 : i32
    %c0_i32_0 = arith.constant 0 : i32
    return %c0_i32, %arg0 : i32, i32
  }
}

</mosaic_0001>

<bundles_post_ra>
// kernel: tpu_custom_call.1
= control target key start
LH: loop header
LB: loop body
LE: loop exit
PB: predicated region body
PF: predicated region fallthrough
CT: control target
= control target key end

     0   :  { %7 = vsyncpa [#allocation3], 0  ;;  %s827_s0 = inlined_call_operand.hbm [shape: s32[1,128], index: 0, kind: input, shape index: {}]   ;;  %s828_s1 = inlined_call_operand.hbm [shape: bf16[3,16,128], index: 1, kind: input, shape index: {}]   ;;  %s829_s2 = inlined_call_operand.hbm [shape: f32[128,128], index: 2, kind: output, shape index: {}]  }
   0x1   :  { %8 = vsyncpa [#allocation6], 0 }
   0x2   :  { %9 = vsyncpa [#allocation4], 0  ;;  %s742_s9 = smov [#allocation2]   ;;  %s743_s11 = smov [#allocation5]  }
   0x3   :  { %s16_s10 = sshll.u32 %s742_s9, 4  ;;  %s25_s12 = sshll.u32 %s743_s11, 4  ;;  %s17_s10 = int_to_ptr.vmem [resolvable:$true] %s16_s10  ;;  %s26_s12 = int_to_ptr.vmem [resolvable:$true] %s25_s12 }
   0x4   :  { %s684_s13 = scalar_lea.vmem %s17_s10, 16  ;;  %s688_s14 = scalar_lea.vmem %s17_s10, 32 }
   0x5   :  { %p685_p0 = scmp.ne.s32.totalorder %s17_s10, %s684_s13  ;;  %p689_p1 = scmp.lt.s32.totalorder %s17_s10, %s17_s10 }
   0x6   :  { %p690_p2 = scmp.lt.s32.totalorder %s688_s14, %s684_s13 }
   0x8   :  { %p691_p3 = por %p690_p2, %p689_p1 }
   0xa   :  { %p692_p4 = pnand %p691_p3, %p685_p0 }
   0xc   :  { %695 = shalt.err (!%p692_p4)
}
   0xd   :  { %19 = dma.hbm_to_vmem [thread:$0]  %s827_s0, 16, %s17_s10, [#allocation3]  }
   0xe   :  { %s704_s17 = scalar_lea.vmem %s26_s12, 384  ;;  %p709_p6 = scmp.lt.s32.totalorder %s26_s12, %s26_s12 }
   0xf   :  { %p705_p5 = scmp.ne.s32.totalorder %s26_s12, %s704_s17  ;;  %p710_p7 = scmp.lt.s32.totalorder %s704_s17, %s704_s17 }
  0x11   :  { %p711_p8 = por %p710_p7, %p709_p6 }
  0x13   :  { %p712_p9 = pnand %p711_p8, %p705_p5 }
  0x15   :  { %715 = shalt.err (!%p712_p9)
}
  0x16   :  { %s744_s18 = smov 64   ;;  %s745_s19 = smov 4  }
  0x17   :  { %31 = dma.hbm_to_vmem [thread:$0]  %s828_s1, 384, %s26_s12, [#allocation6], %s744_s18, %s744_s18, %s745_s19  }
  0x18   :  { %736 = dma.done.wait [#allocation3], 16  }
  0x19   :  { %737 = vsyncadd [#allocation3], 4294967280 }
  0x1a   :  { %738 = dma.done.wait [#allocation6], 384  }
  0x1b   :  { %739 = vsyncadd [#allocation6], 4294966912  ;;  %v43_v0 = vlaneseq  ;;  %v673_v2 = vld [vmem:[#allocation5 + $0x8] sm:$0xff]   ;;  %v674_v4 = vld [vmem:[#allocation5 + $0x10] sm:$0xff]   ;;  %v746_v7 = vmov 1.0|1.0  }
  0x1c   :  { %68 = vxpose.xlu0.c.b16.start.end [1/1] (short) %v673_v2, 128  ;;  %358 = vxpose.xlu1.c.b16.start.end [1/1] (short) %v674_v4, 128  ;;  %v545_v5 = vld [vmem:[#allocation2] ss:$0 sm:$0xff]  ;;  %v675_v8 = vld [vmem:[#allocation5] sm:$0xff]   ;;  %vm84_vm3 = vcmask 130048   ;;  %s747_s0 = smov [#allocation7]  }
  0x1d   :  { %v44_v1 = vshrl.u32 %v43_v0, 7  ;;  %s532_s1 = sshll.u32 %s747_s0, 4  ;;  %s533_s1 = int_to_ptr.vmem [resolvable:$true] %s532_s1 }
  0x1e   :  { %s716_s22 = scalar_lea.vmem %s533_s1, 2048  ;;  %p721_p11 = scmp.lt.s32.totalorder %s533_s1, %s533_s1 }
  0x1f   :  { %v45_v3 = vadd.s32 8, %v44_v1  ;;  %vm50_vm0 = vcmp.eq.s32.totalorder %v44_v1, %v545_v5  ;;  %p717_p10 = scmp.ne.s32.totalorder %s533_s1, %s716_s22  ;;  %p722_p12 = scmp.lt.s32.totalorder %s716_s22, %s716_s22 }
  0x21   :  { %vm51_vm1 = vcmp.eq.s32.totalorder %v45_v3, %v545_v5  ;;  %p723_p13 = por %p722_p12, %p721_p11 }
  0x22   :  { %vm771_vm2 = vmpackc.low %vm51_vm1, %vm50_vm0 }
  0x23   :  { %608 = vmatprep.subr.msk.bf16.mxu0 %vm771_vm2, %v746_v7  ;;  %662 = vmatprep.subr.msk.bf16.mxu1 %vm771_vm2, %v746_v7  ;;  %p724_p0 = pnand %p723_p13, %p717_p10 }
  0x24   :  { %609 = vmatpush3.bf16.msk.msra.mxu0 %vm771_vm2, %v746_v7  ;;  %663 = vmatpush3.bf16.msk.msra.mxu1 %vm771_vm2, %v746_v7 }
  0x25   :  { %626 = vmatprep.subr.msk.bf16.mxu1 %vm771_vm2, %v746_v7  ;;  %644 = vmatprep.subr.msk.bf16.mxu0 %vm771_vm2, %v746_v7 }
  0x39   :  { %212 = vxpose.xlu0.c.b16.start.end [1/1] (short) %v675_v8, 128 }
  0x7e   :  { %v76_v9 = vpop.trf.xlu0  ;;  %v366_v10 = vpop.trf.xlu1 }
  0x7f   :  { %610 = vmatprep.mubr.msk.bf16.mxu0 %vm84_vm3, %v76_v9 }
  0x82   :  { %v77_v11 = vpop.trf.xlu0  ;;  %v367_v12 = vpop.trf.xlu1 }
  0x83   :  { %611 = vmatmul.mubr.msk.bf16.vlgmr.msra.gmra.mxu0 %vm84_vm3, %v77_v11 }
  0x84   :  { %645 = vmatpush3.bf16.msk.msra.mxu0 %vm771_vm2, %v746_v7 }
  0x86   :  { %v78_v13 = vpop.trf.xlu0  ;;  %v368_v15 = vpop.trf.xlu1 }
  0x87   :  { %614 = vmatprep.mubr.msk.bf16.mxu0 %vm84_vm3, %v78_v13 }
  0x8a   :  { %v79_v14 = vpop.trf.xlu0  ;;  %v369_v17 = vpop.trf.xlu1 }
  0x8b   :  { %615 = vmatmul.mubr.msk.bf16.gmra.mxu0 %vm84_vm3, %v79_v14 }
  0x8c   :  { %646 = vmatprep.mubr.msk.bf16.mxu0 %vm84_vm3, %v366_v10 }
  0x8e   :  { %v80_v16 = vpop.trf.xlu0  ;;  %v370_v20 = vpop.trf.xlu1 }
  0x8f   :  { %618 = vmatprep.mubr.msk.bf16.mxu1 %vm84_vm3, %v80_v16 }
  0x92   :  { %v81_v18 = vpop.trf.xlu0  ;;  %v371_v22 = vpop.trf.xlu1 }
  0x93   :  { %619 = vmatmul.mubr.msk.bf16.vlgmr.msra.gmra.mxu1 %vm84_vm3, %v81_v18  ;;  %647 = vmatmul.mubr.msk.bf16.vlgmr.msra.gmra.mxu0 %vm84_vm3, %v367_v12 }
  0x94   :  { %627 = vmatpush3.bf16.msk.msra.mxu1 %vm771_vm2, %v746_v7  ;;  %650 = vmatprep.mubr.msk.bf16.mxu0 %vm84_vm3, %v368_v15 }
  0x96   :  { %v82_v19 = vpop.trf.xlu0  ;;  %v372_v25 = vpop.trf.xlu1 }
  0x97   :  { %622 = vmatprep.mubr.msk.bf16.mxu1 %vm84_vm3, %v82_v19 }
  0x9a   :  { %v83_v21 = vpop.trf.xlu0  ;;  %v373_v27 = vpop.trf.xlu1 }
  0x9b   :  { %623 = vmatmul.mubr.msk.bf16.gmra.mxu1 %vm84_vm3, %v83_v21  ;;  %651 = vmatmul.mubr.msk.bf16.gmra.mxu0 %vm84_vm3, %v369_v17 }
  0x9c   :  { %654 = vmatprep.mubr.msk.bf16.mxu0 %vm84_vm3, %v370_v20 }
  0x9e   :  { %v220_v23 = vpop.trf.xlu0 }
  0x9f   :  { %628 = vmatprep.mubr.msk.bf16.mxu1 %vm84_vm3, %v220_v23 }
  0xa2   :  { %v221_v24 = vpop.trf.xlu0 }
  0xa3   :  { %629 = vmatmul.mubr.msk.bf16.vlgmr.msra.gmra.mxu1 %vm84_vm3, %v221_v24  ;;  %655 = vmatmul.mubr.msk.bf16.gmra.mxu0 %vm84_vm3, %v371_v22 }
  0xa4   :  { %658 = vmatprep.mubr.msk.bf16.mxu0 %vm84_vm3, %v372_v25 }
  0xa6   :  { %v222_v26 = vpop.trf.xlu0 }
  0xa7   :  { %632 = vmatprep.mubr.msk.bf16.mxu1 %vm84_vm3, %v222_v26 }
  0xaa   :  { %v223_v28 = vpop.trf.xlu0 }
  0xab   :  { %633 = vmatmul.mubr.msk.bf16.gmra.mxu1 %vm84_vm3, %v223_v28  ;;  %659 = vmatmul.mubr.msk.bf16.gmra.mxu0 %vm84_vm3, %v373_v27 }
  0xae   :  { %v224_v29 = vpop.trf.xlu0 }
  0xaf   :  { %636 = vmatprep.mubr.msk.bf16.mxu1 %vm84_vm3, %v224_v29 }
  0xb2   :  { %v225_v30 = vpop.trf.xlu0 }
  0xb3   :  { %637 = vmatmul.mubr.msk.bf16.gmra.mxu1 %vm84_vm3, %v225_v30 }
  0xb6   :  { %v226_v31 = vpop.trf.xlu0 }
  0xb7   :  { %640 = vmatprep.mubr.msk.bf16.mxu1 %vm84_vm3, %v226_v31 }
  0xba   :  { %v227_v32 = vpop.trf.xlu0 }
  0xbb   :  { %641 = vmatmul.mubr.msk.bf16.gmra.mxu1 %vm84_vm3, %v227_v32 }
 0x143   :  { %v612_v33 = vpop.f32.mrf.mxu0 }
 0x145   :  { %v143_v34 = vpop.f32.mrf.mxu0 }
 0x147   :  { %v613_v35 = vpop.f32.mrf.mxu0 }
 0x149   :  { %v146_v36 = vpop.f32.mrf.mxu0 }
 0x14b   :  { %v616_v37 = vpop.f32.mrf.mxu0 }
 0x14d   :  { %v159_v38 = vpop.f32.mrf.mxu0 }
 0x14f   :  { %v617_v39 = vpop.f32.mrf.mxu0 }
 0x151   :  { %v162_v40 = vpop.f32.mrf.mxu0 }
 0x153   :  { %v620_v41 = vpop.f32.mrf.mxu1  ;;  %v648_v42 = vpop.f32.mrf.mxu0 }
 0x155   :  { %v175_v43 = vpop.f32.mrf.mxu1  ;;  %v432_v44 = vpop.f32.mrf.mxu0 }
 0x157   :  { %v621_v45 = vpop.f32.mrf.mxu1  ;;  %v649_v46 = vpop.f32.mrf.mxu0 }
 0x159   :  { %v178_v47 = vpop.f32.mrf.mxu1  ;;  %v435_v48 = vpop.f32.mrf.mxu0 }
 0x15b   :  { %v624_v49 = vpop.f32.mrf.mxu1  ;;  %v652_v50 = vpop.f32.mrf.mxu0 }
 0x15d   :  { %v815_v51 = vpop.f32.mrf.mxu1  ;;  %v448_v52 = vpop.f32.mrf.mxu0 }
 0x15f   :  { %v817_v53 = vpop.f32.mrf.mxu1  ;;  %v653_v54 = vpop.f32.mrf.mxu0 }
 0x161   :  { %v819_v55 = vpop.f32.mrf.mxu1  ;;  %v451_v57 = vpop.f32.mrf.mxu0 }
 0x163   :  { %v630_v56 = vpop.f32.mrf.mxu1  ;;  %v656_v63 = vpop.f32.mrf.mxu0 }
 0x164   :  { %v295_v58 = vadd.f32 %v630_v56, %v612_v33 }
 0x165   :  { %v286_v59 = vpop.f32.mrf.mxu1  ;;  %v464_v6 = vpop.f32.mrf.mxu0 }
 0x166   :  { %v497_v60 = vadd.f32 %v648_v42, %v295_v58  ;;  %v287_v61 = vadd.f32 %v286_v59, %v143_v34 }
 0x167   :  { %v631_v62 = vpop.f32.mrf.mxu1  ;;  %v657_v13 = vpop.f32.mrf.mxu0 }
 0x168   :  { %513 = vst [vmem:[#allocation7 + $0x10] sm:$0xff] %v497_v60  ;;  %v495_v0 = vadd.f32 %v432_v44, %v287_v61  ;;  %v298_v1 = vadd.f32 %v631_v62, %v613_v35 }
 0x169   :  { %v289_v2 = vpop.f32.mrf.mxu1  ;;  %v467_v20 = vpop.f32.mrf.mxu0 }
 0x16a   :  { %511 = vst [vmem:[#allocation7] sm:$0xff] %v495_v0  ;;  %v498_v3 = vadd.f32 %v649_v46, %v298_v1  ;;  %v290_v4 = vadd.f32 %v289_v2, %v146_v36 }
 0x16b   :  { %v634_v5 = vpop.f32.mrf.mxu1  ;;  %v660_v27 = vpop.f32.mrf.mxu0 }
 0x16c   :  { %514 = vst [vmem:[#allocation7 + $0x18] sm:$0xff] %v498_v3  ;;  %v496_v7 = vadd.f32 %v435_v48, %v290_v4  ;;  %v311_v8 = vadd.f32 %v634_v5, %v616_v37 }
 0x16d   :  { %v302_v9 = vpop.f32.mrf.mxu1  ;;  %v480_v33 = vpop.f32.mrf.mxu0 }
 0x16e   :  { %512 = vst [vmem:[#allocation7 + $0x8] sm:$0xff] %v496_v7  ;;  %v501_v10 = vadd.f32 %v652_v50, %v311_v8  ;;  %v303_v11 = vadd.f32 %v302_v9, %v159_v38 }
 0x16f   :  { %v635_v12 = vpop.f32.mrf.mxu1 }
 0x170   :  { %517 = vst [vmem:[#allocation7 + $0x30] sm:$0xff] %v501_v10  ;;  %v499_v14 = vadd.f32 %v448_v52, %v303_v11  ;;  %v314_v15 = vadd.f32 %v635_v12, %v617_v39 }
 0x171   :  { %v305_v16 = vpop.f32.mrf.mxu1 }
 0x172   :  { %515 = vst [vmem:[#allocation7 + $0x20] sm:$0xff] %v499_v14  ;;  %v502_v17 = vadd.f32 %v653_v54, %v314_v15  ;;  %v306_v18 = vadd.f32 %v305_v16, %v162_v40  ;;  %v661_v40 = vpop.f32.mrf.mxu0 }
 0x173   :  { %v638_v19 = vpop.f32.mrf.mxu1 }
 0x174   :  { %518 = vst [vmem:[#allocation7 + $0x38] sm:$0xff] %v502_v17  ;;  %v500_v21 = vadd.f32 %v451_v57, %v306_v18  ;;  %v327_v22 = vadd.f32 %v638_v19, %v620_v41 }
 0x175   :  { %v318_v23 = vpop.f32.mrf.mxu1 }
 0x176   :  { %516 = vst [vmem:[#allocation7 + $0x28] sm:$0xff] %v500_v21  ;;  %v505_v24 = vadd.f32 %v656_v63, %v327_v22  ;;  %v319_v25 = vadd.f32 %v318_v23, %v175_v43 }
 0x177   :  { %v639_v26 = vpop.f32.mrf.mxu1 }
 0x178   :  { %521 = vst [vmem:[#allocation7 + $0x50] sm:$0xff] %v505_v24  ;;  %v503_v28 = vadd.f32 %v464_v6, %v319_v25  ;;  %v330_v29 = vadd.f32 %v639_v26, %v621_v45 }
 0x179   :  { %v321_v30 = vpop.f32.mrf.mxu1 }
 0x17a   :  { %519 = vst [vmem:[#allocation7 + $0x40] sm:$0xff] %v503_v28  ;;  %v506_v31 = vadd.f32 %v657_v13, %v330_v29  ;;  %v322_v32 = vadd.f32 %v321_v30, %v178_v47  ;;  %v483_v47 = vpop.f32.mrf.mxu0 }
 0x17b   :  { %v642_v34 = vpop.f32.mrf.mxu1 }
 0x17c   :  { %522 = vst [vmem:[#allocation7 + $0x58] sm:$0xff] %v506_v31  ;;  %v504_v35 = vadd.f32 %v467_v20, %v322_v32  ;;  %v343_v36 = vadd.f32 %v642_v34, %v624_v49 }
 0x17d   :  { %v334_v37 = vpop.f32.mrf.mxu1 }
 0x17e   :  { %520 = vst [vmem:[#allocation7 + $0x48] sm:$0xff] %v504_v35  ;;  %v509_v38 = vadd.f32 %v660_v27, %v343_v36  ;;  %v335_v39 = vadd.f32 %v334_v37, %v815_v51 }
 0x17f   :  { %v643_v41 = vpop.f32.mrf.mxu1 }
 0x180   :  { %525 = vst [vmem:[#allocation7 + $0x70] sm:$0xff] %v509_v38  ;;  %v507_v42 = vadd.f32 %v480_v33, %v335_v39  ;;  %v346_v43 = vadd.f32 %v643_v41, %v817_v53 }
 0x181   :  { %v337_v44 = vpop.f32.mrf.mxu1 }
 0x182   :  { %523 = vst [vmem:[#allocation7 + $0x60] sm:$0xff] %v507_v42  ;;  %v510_v45 = vadd.f32 %v661_v40, %v346_v43  ;;  %v338_v46 = vadd.f32 %v337_v44, %v819_v55 }
 0x184   :  { %526 = vst [vmem:[#allocation7 + $0x78] sm:$0xff] %v510_v45  ;;  %v508_v48 = vadd.f32 %v483_v47, %v338_v46 }
 0x186   :  { %524 = vst [vmem:[#allocation7 + $0x68] sm:$0xff] %v508_v48 }
 0x187   :  { %727 = shalt.err (!%p724_p0)
}
 0x188   :  { %s748_s23 = smov 128   ;;  %s749_s24 = smov 8  }
 0x189   :  { %538 = dma.vmem_to_hbm [thread:$0]  %s533_s1, 2048, %s829_s2, [#allocation4], %s748_s23, %s748_s23, %s749_s24  }
 0x18a   :  { %740 = dma.done.wait [#allocation4], 2048  }
 0x18b   :  { %741 = vsyncadd [#allocation4], 4294965248 }
 0x18c   :  { %542 = vsyncpa [#allocation3], 1 }
 0x18d   :  { %543 = vsyncpa [#allocation6], 1 }
 0x18e   :  { %544 = vsyncpa [#allocation4], 1 }

</bundles_post_ra>
